<compile_context>
chip_gen: v7x
topology: tpu7x:2x2x1
jax: 0.10.0
libtpu: 0.0.40
codegen_flags: <defaults>
</compile_context>

<pallas_src>
import functools

import jax
import jax.numpy as jnp
from jax import lax
from jax.experimental import pallas as pl
from jax.experimental.pallas import tpu as pltpu

_LANE = 128                      # TPU lane width
_SUBM = 256                      # rows per in-kernel sub-chunk (register-friendly)
_TM_CAP = 4096                   # upper bound on the batch tile
_SMALL_B = 256                   # below this, skip the grid entirely
_VMEM_BUDGET = 48 * 1024 * 1024  # safe on v7x (64 MiB/TC); well under v5e/v6e 128 MiB


def _round_up(n: int, m: int) -> int:
    return ((n + m - 1) // m) * m


def _cdiv(a: int, b: int) -> int:
    return (a + b - 1) // b


def _fused_mlp_kernel(*refs, num_layers: int, sub_rows: int):
    """refs = (x_ref, w0, b0, w1, b1, ..., o_ref).

    Chains every Linear(+ReLU) layer entirely in VMEM/vregs; only the final
    activation is stored to the output ref (true width, masked vst if < 128).
    """
    x_ref, o_ref = refs[0], refs[-1]
    wb = refs[1:-1]

    def layer_stack(h):
        for layer in range(num_layers):
            w = wb[2 * layer][...]              # bf16 weights, VMEM-resident
            b = wb[2 * layer + 1][...]          # f32 bias, broadcasts over rows
            h = jnp.dot(h.astype(w.dtype), w,
                        preferred_element_type=jnp.float32) + b
            if layer != num_layers - 1:         # ReLU on all but the last layer
                h = jnp.maximum(h, 0.0)
        return h

    rows = x_ref.shape[0]
    if rows <= sub_rows:
        # Small tile: one shot.
        o_ref[...] = layer_stack(x_ref[...]).astype(o_ref.dtype)
    else:
        # Large tile: short unrolled loop over register-sized row sub-chunks so the
        # big DMA tile doesn't force the bias-add/ReLU/store path to spill.
        n_sub = rows // sub_rows                # rows is a multiple of sub_rows

        def body(s, carry):
            r0 = pl.multiple_of(s * sub_rows, sub_rows)
            h = layer_stack(x_ref[pl.ds(r0, sub_rows), :])
            o_ref[pl.ds(r0, sub_rows), :] = h.astype(o_ref.dtype)
            return carry

        lax.fori_loop(0, n_sub, body, 0, unroll=True)


def init_mlp_params(hidden_sizes, key, dtype=jnp.float32):
    """nn.Linear-style init. Weight stored transposed as [in, out], bias as [1, out]."""
    params = []
    for in_sz, out_sz in zip(hidden_sizes[:-1], hidden_sizes[1:]):
        key, kw, kb = jax.random.split(key, 3)
        bound = 1.0 / (in_sz ** 0.5)            # PyTorch default uniform bound
        w = jax.random.uniform(kw, (in_sz, out_sz), dtype, -bound, bound)
        b = jax.random.uniform(kb, (1, out_sz), dtype, -bound, bound)
        params.append((w, b))
    return params


def prepare_params(params, compute_dtype=jnp.bfloat16):
    """Pad intermediate widths to multiples of 128 (exact: zeros flow through
    Linear+ReLU unchanged) and cast weights to bf16 for the MXU. Biases stay f32
    (added to the f32 accumulator; v5e's VPU has no bf16). The FIRST input dim and
    LAST output dim are never padded, so the kernel reads/writes true shapes."""
    ws = [w for w, _ in params]
    bs = [b for _, b in params]
    n = len(params)
    for l in range(n - 1):
        d = ws[l].shape[1]
        d_pad = _round_up(d, _LANE)
        if d_pad != d:
            ws[l] = jnp.pad(ws[l], ((0, 0), (0, d_pad - d)))
            bs[l] = jnp.pad(bs[l], ((0, 0), (0, d_pad - d)))
            ws[l + 1] = jnp.pad(ws[l + 1], ((0, d_pad - d), (0, 0)))
    ws = [w.astype(compute_dtype) for w in ws]
    bs = [b.astype(jnp.float32) for b in bs]
    return [a for pair in zip(ws, bs) for a in pair]   # [w0, b0, w1, b1, ...]


def mlp_forward(x, params):
    """Full fused MLP forward pass. Dropout(p=0.0) is an identity and is omitted."""
    flat_wb = prepare_params(params)
    num_layers = len(params)
    B, d_in = x.shape
    d_out = params[-1][0].shape[1]              # true output width, never padded

    kernel = functools.partial(_fused_mlp_kernel,
                               num_layers=num_layers, sub_rows=_SUBM)

    flops = 2 * B * sum(w.shape[0] * w.shape[1] for w in flat_wb[0::2])
    bytes_accessed = (x.size * x.dtype.itemsize
                      + sum(a.size * a.dtype.itemsize for a in flat_wb)
                      + B * d_out * x.dtype.itemsize)
    cost = pl.CostEstimate(flops=flops, transcendentals=0,
                           bytes_accessed=bytes_accessed)

    out_shape = jax.ShapeDtypeStruct((B, d_out), x.dtype)

    if B <= _SMALL_B:
        # Small batch: everything mapped straight into VMEM.  No grid, no pipeline
        # prologue/epilogue, no double-buffer copies.
        vmem_spec = pl.BlockSpec(memory_space=pltpu.MemorySpace.VMEM)
        return pl.pallas_call(
            kernel,
            out_shape=out_shape,
            in_specs=[vmem_spec] * (1 + len(flat_wb)),
            out_specs=vmem_spec,
            compiler_params=pltpu.CompilerParams(vmem_limit_bytes=_VMEM_BUDGET),
            cost_estimate=cost,
        )(x, *flat_wb)

    # Large batch: tile rows of x / out; weights + biases stay VMEM-resident across
    # grid steps (constant index_map); batch axis runs in parallel (megacore).
    bytes_per_row = (d_in + d_out) * x.dtype.itemsize
    weight_bytes = 2 * sum(a.size * a.dtype.itemsize for a in flat_wb)  # double-buffered
    budget_rows = max(_SUBM, (_VMEM_BUDGET - weight_bytes) // (2 * bytes_per_row))
    balance_rows = _round_up(_cdiv(B, 2), _SUBM)   # ensures >= 2 programs (v7x: 2 TCs)
    tm = min(_TM_CAP, budget_rows, balance_rows)
    tm = max(_SUBM, (tm // _SUBM) * _SUBM)
    grid = (_cdiv(B, tm),)

    x_spec = pl.BlockSpec((tm, d_in), lambda i: (i, 0))
    # TODO(synk): for very wide reused layers, add pipeline_mode=pl.Buffered(1) on the
    # constant-index weight specs to single-buffer them (halves weight VMEM on v7x).
    wb_specs = [pl.BlockSpec(a.shape, lambda i: (0, 0)) for a in flat_wb]
    o_spec = pl.BlockSpec((tm, d_out), lambda i: (i, 0))

    return pl.pallas_call(
        kernel,
        out_shape=out_shape,
        grid=grid,
        in_specs=[x_spec] + wb_specs,
        out_specs=o_spec,
        compiler_params=pltpu.CompilerParams(
            dimension_semantics=("parallel",),
            vmem_limit_bytes=_VMEM_BUDGET),
        cost_estimate=cost,
    )(x, *flat_wb)


if __name__ == "__main__":
    # Small shapes consistent with the module: hidden_sizes = [32, 64, 16]
    hidden_sizes = [32, 64, 16]
    batch = 8

    key = jax.random.PRNGKey(0)
    key, kx = jax.random.split(key)
    x = jax.random.normal(kx, (batch, hidden_sizes[0]), jnp.float32)
    params = init_mlp_params(hidden_sizes, key)

    def ref_forward(xs):  # plain-JAX reference (same math as PyTorch eval forward)
        h = xs
        for idx, (w, b) in enumerate(params):
            h = h @ w + b
            if idx != len(params) - 1:
                h = jnp.maximum(h, 0.0)
        return h

    # Small-batch (gridless) path.
    out = mlp_forward(x, params)
    jax.block_until_ready(out)
    assert out.shape == (batch, hidden_sizes[-1]), out.shape
    # bf16 matmul operands with f32 accumulation -> loosened tolerance vs f32 reference.
    assert jnp.allclose(out, ref_forward(x), atol=5e-2, rtol=5e-2), (
        float(jnp.max(jnp.abs(out - ref_forward(x)))))

    # Tiled (grid) path: large enough batch for >= 2 grid programs + partial last tile.
    big_batch = 600
    key, kb = jax.random.split(key)
    xb = jax.random.normal(kb, (big_batch, hidden_sizes[0]), jnp.float32)
    out_b = mlp_forward(xb, params)
    jax.block_until_ready(out_b)
    assert out_b.shape == (big_batch, hidden_sizes[-1]), out_b.shape
    assert jnp.allclose(out_b, ref_forward(xb), atol=5e-2, rtol=5e-2)

    print("KERNEL_OK")
</pallas_src>

<mosaic_0001>
module attributes {stable_mosaic.version = 11 : i64} {
  func.func @_fused_mlp_kernel(%arg0: memref<8x32xf32, #tpu.memory_space<vmem>>, %arg1: memref<32x128xbf16, #tpu.memory_space<vmem>>, %arg2: memref<1x128xf32, #tpu.memory_space<vmem>>, %arg3: memref<128x16xbf16, #tpu.memory_space<vmem>>, %arg4: memref<1x16xf32, #tpu.memory_space<vmem>>, %arg5: memref<8x16xf32, #tpu.memory_space<vmem>>) attributes {dimension_semantics = [], scalar_prefetch = 0 : i64, scratch_operands = 0 : i64, tpu.core_type = #tpu.core_type<tc>} {
    %c0 = arith.constant 0 : index
    %c0_0 = arith.constant 0 : index
    %0 = vector.load %arg0[%c0, %c0_0] : memref<8x32xf32, #tpu.memory_space<vmem>>, vector<8x32xf32>
    %c0_1 = arith.constant 0 : index
    %c0_2 = arith.constant 0 : index
    %1 = vector.load %arg1[%c0_1, %c0_2] : memref<32x128xbf16, #tpu.memory_space<vmem>>, vector<32x128xbf16>
    %c0_3 = arith.constant 0 : index
    %c0_4 = arith.constant 0 : index
    %2 = vector.load %arg2[%c0_3, %c0_4] : memref<1x128xf32, #tpu.memory_space<vmem>>, vector<1x128xf32>
    %3 = arith.truncf %0 : vector<8x32xf32> to vector<8x32xbf16>
    %cst = arith.constant dense<0.000000e+00> : vector<8x128xf32>
    %4 = tpu.matmul %3, %1, %cst {dimension_numbers = #tpu.dot_dimension_numbers<[1], [0], [0], [1], [0, 0, 1, 1], [], []>} : vector<8x32xbf16>, vector<32x128xbf16>, vector<8x128xf32> -> vector<8x128xf32>
    %5 = vector.broadcast %2 : vector<1x128xf32> to vector<8x128xf32>
    %6 = arith.addf %4, %5 : vector<8x128xf32>
    %cst_5 = arith.constant 0.000000e+00 : f32
    %7 = vector.broadcast %cst_5 : f32 to vector<8x128xf32>
    %8 = arith.maximumf %6, %7 : vector<8x128xf32>
    %c0_6 = arith.constant 0 : index
    %c0_7 = arith.constant 0 : index
    %9 = vector.load %arg3[%c0_6, %c0_7] : memref<128x16xbf16, #tpu.memory_space<vmem>>, vector<128x16xbf16>
    %c0_8 = arith.constant 0 : index
    %c0_9 = arith.constant 0 : index
    %10 = vector.load %arg4[%c0_8, %c0_9] : memref<1x16xf32, #tpu.memory_space<vmem>>, vector<1x16xf32>
    %11 = arith.truncf %8 : vector<8x128xf32> to vector<8x128xbf16>
    %cst_10 = arith.constant dense<0.000000e+00> : vector<8x16xf32>
    %12 = tpu.matmul %11, %9, %cst_10 {dimension_numbers = #tpu.dot_dimension_numbers<[1], [0], [0], [1], [0, 0, 1, 1], [], []>} : vector<8x128xbf16>, vector<128x16xbf16>, vector<8x16xf32> -> vector<8x16xf32>
    %13 = vector.broadcast %10 : vector<1x16xf32> to vector<8x16xf32>
    %14 = arith.addf %12, %13 : vector<8x16xf32>
    %c0_11 = arith.constant 0 : index
    %c0_12 = arith.constant 0 : index
    %15 = vector.load %arg5[%c0_11, %c0_12] : memref<8x16xf32, #tpu.memory_space<vmem>>, vector<8x16xf32>
    tpu.vector_store %arg5[%c0_11, %c0_12], %14 {strides = array<i32>} : memref<8x16xf32, #tpu.memory_space<vmem>>, vector<8x16xf32>,
    return
  }
}

</mosaic_0001>

<bundles_post_ra>
// kernel: tpu_custom_call.1
= control target key start
LH: loop header
LB: loop body
LE: loop exit
PB: predicated region body
PF: predicated region fallthrough
CT: control target
= control target key end

     0   :  { %v310_v1 = vmov 0.0   ;;  %vm311_vm0 = vmmov 0   ;;  %vm47_vm1 = vcmask 261120   ;;  %s394_s0 = inlined_call_operand.vmem [shape: f32[8,32], index: 0, kind: input, shape index: {}]   ;;  %s395_s1 = inlined_call_operand.vmem [shape: bf16[32,128], index: 1, kind: input, shape index: {}]   ;;  %s396_s2 = inlined_call_operand.vmem [shape: f32[1,128], index: 2, kind: input, shape index: {}]   ;;  %s397_s3 = inlined_call_operand.vmem [shape: bf16[128,16], index: 3, kind: input, shape index: {}]   ;;  %s398_s4 = inlined_call_operand.vmem [shape: f32[1,16], index: 4, kind: input, shape index: {}]   ;;  %s399_s5 = inlined_call_operand.hbm [shape: f32[8,16], index: 5, kind: output, shape index: {}]  }
   0x1   :  { %v276_v0 = vld [vmem:[%s395_s1] sm:$0xff]   ;;  %245 = vmatprep.subr.bf16.mxu0 %v310_v1  ;;  %v277_v2 = vld [vmem:[%s395_s1 + $0x8] sm:$0xff]   ;;  %253 = vmatprep.subr.bf16.mxu1 %v310_v1  ;;  %v280_v7 = vld [vmem:[%s397_s3 + $0x10] sm:$0xff]  }
   0x2   :  { %246 = vmatpush3.bf16.msra.mxu0 %v276_v0  ;;  %249 = vmatprep.mubr.msk.bf16.mxu0 %vm311_vm0, %v310_v1  ;;  %v22_v3 = vld [vmem:[%s394_s0] sm:$0xff]  ;;  %v279_v6 = vld [vmem:[%s397_s3 + $0x8] sm:$0xff]  }
   0x3   :  { %247 = vmatprep.subr.bf16.mxu0 %v310_v1  ;;  %v278_v4 = vld [vmem:[%s397_s3] sm:$0xff]   ;;  %269 = vmatprep.mubr.msk.bf16.mxu1 %vm311_vm0, %v310_v1  ;;  %v28_v5 = vpack.c.bf16 %v22_v3, %v22_v3 }
   0x4   :  { %254 = vmatpush3.bf16.msra.mxu1 %v278_v4 }
   0x5   :  { %255 = vmatprep.subr.bf16.mxu1 %v310_v1 }
   0x6   :  { %248 = vmatpush3.bf16.msra.mxu0 %v277_v2 }
   0x8   :  { %256 = vmatpush3.bf16.msra.mxu1 %v279_v6 }
   0x9   :  { %250 = vmatmul.mubr.msk.bf16.vlgmr.msra.gmra.mrb[0].mxu0 %vm47_vm1, %v28_v5  ;;  %257 = vmatprep.subr.bf16.mxu1 %v310_v1 }
   0xa   :  { %10 = vsyncpa [#allocation3], 0  ;;  %v281_v8 = vld [vmem:[%s397_s3 + $0x18] sm:$0xff]   ;;  %v282_v9 = vld [vmem:[%s397_s3 + $0x20] sm:$0xff]   ;;  %s312_s17 = smov [#allocation2]   ;;  %vm204_vm2 = vcmask 130048  }
   0xb   :  { %v283_v10 = vld [vmem:[%s397_s3 + $0x28] sm:$0xff]   ;;  %v284_v11 = vld [vmem:[%s397_s3 + $0x30] sm:$0xff]   ;;  %v285_v12 = vld [vmem:[%s397_s3 + $0x38] sm:$0xff]   ;;  %s212_s18 = sshll.u32 %s312_s17, 4  ;;  %s213_s18 = int_to_ptr.vmem [resolvable:$true] %s212_s18 }
   0xc   :  { %258 = vmatpush3.bf16.msra.mxu1 %v280_v7  ;;  %v220_v13 = vld [vmem:[%s396_s2] ss:$0 sm:$0xff]  ;;  %s286_s2 = scalar_lea.vmem %s213_s18, 128  ;;  %p291_p1 = scmp.lt.s32.totalorder %s213_s18, %s213_s18 }
   0xd   :  { %259 = vmatprep.subr.bf16.mxu1 %v310_v1  ;;  %v224_v21 = vld [vmem:[%s398_s4] ss:$0 sm:$0xff]  ;;  %p287_p0 = scmp.ne.s32.totalorder %s213_s18, %s286_s2  ;;  %p292_p2 = scmp.lt.s32.totalorder %s286_s2, %s286_s2 }
   0xf   :  { %p293_p3 = por %p292_p2, %p291_p1 }
  0x10   :  { %260 = vmatpush3.bf16.msra.mxu1 %v281_v8 }
  0x11   :  { %261 = vmatprep.subr.bf16.mxu1 %v310_v1  ;;  %p294_p4 = pnand %p293_p3, %p287_p0 }
  0x14   :  { %262 = vmatpush3.bf16.msra.mxu1 %v282_v9 }
  0x15   :  { %263 = vmatprep.subr.bf16.mxu1 %v310_v1 }
  0x18   :  { %264 = vmatpush3.bf16.msra.mxu1 %v283_v10 }
  0x19   :  { %265 = vmatprep.subr.bf16.mxu1 %v310_v1 }
  0x1c   :  { %266 = vmatpush3.bf16.msra.mxu1 %v284_v11 }
  0x1d   :  { %267 = vmatprep.subr.bf16.mxu1 %v310_v1 }
  0x20   :  { %268 = vmatpush3.bf16.msra.mxu1 %v285_v12 }
  0xdc   :  { %v85_v14 = vpop.f32.mrb[0].mxu0 }
  0xdd   :  { %v86_v15 = vadd.f32 %v220_v13, %v85_v14  ;;  %v251_v16 = vpop.f32.mrb[1].mxu0 }
  0xde   :  { %v88_v17 = vpop.f32.mrb[2].mxu0 }
  0xdf   :  { %v91_v18 = vmax.f32 %v86_v15, 0.0  ;;  %v252_v19 = vpop.f32.mrb[3].mxu0 }
  0xe1   :  { %v109_v20 = vpack.c.bf16 %v91_v18, %v91_v18 }
  0xe3   :  { %270 = vmatmul.mubr.bf16.vlgmr.msra.gmra.mrb[0].mxu1 %v109_v20 }
 0x1b6   :  { %v198_v22 = vpop.f32.mrb[0].mxu1 }
 0x1b7   :  { %v199_v23 = vadd.f32 %v224_v21, %v198_v22  ;;  %v271_v24 = vpop.f32.mrb[1].mxu1 }
 0x1b8   :  { %v201_v25 = vpop.f32.mrb[2].mxu1 }
 0x1b9   :  { %v272_v26 = vpop.f32.mrb[3].mxu1  ;;  %205 = vst.msk [vmem:[#allocation2] sm:$0xff] %vm204_vm2, %v199_v23 }
 0x1ba   :  { %297 = shalt.err (!%p294_p4)
}
 0x1bb   :  { %s298_s4 = scalar_lea.hbm %s399_s5, 128 }
 0x1bc   :  { %p299_p5 = scmp.ne.s32.totalorder %s399_s5, %s298_s4  ;;  %p302_p6 = scmp.lt.u32.totalorder %s298_s4, %s399_s5 }
 0x1be   :  { %p304_p7 = pnand %p302_p6, %p299_p5 }
 0x1c0   :  { %307 = shalt.err (!%p304_p7)
}
 0x1c1   :  { %215 = dma.vmem_to_hbm [thread:$0]  %s213_s18, 128, %s399_s5, [#allocation3]  }
 0x1c2   :  { %308 = dma.done.wait [#allocation3], 128  }
 0x1c3   :  { %309 = vsyncadd [#allocation3], 4294967168 }
 0x1c4   :  { %219 = vsyncpa [#allocation3], 1 }

</bundles_post_ra>
